<compile_context>
chip_gen: v7x
topology: tpu7x:2x2x1
jax: 0.10.0
libtpu: 0.0.40
codegen_flags: <defaults>
</compile_context>

<pallas_src>
import functools
import math

import jax
import jax.numpy as jnp
from jax.experimental import pallas as pl
from jax.experimental.pallas import tpu as pltpu

_NEG_INF = -1e30  # finite "minus infinity" -> exp underflows to 0, never NaN


def _round_up(x, m):
    return (x + m - 1) // m * m


# ---------------------------------------------------------------------------
# Kernel 1: fused Q/K/V projection, emitted in head-major [H, N, head_dim].
# ---------------------------------------------------------------------------
def _qkv_proj_kernel(x_ref, wq_ref, wk_ref, wv_ref, bq_ref, bk_ref, bv_ref,
                     q_ref, k_ref, v_ref, *, num_head, head_dim):
    x = x_ref[...]                                      # [Tn, D_in] bf16

    def project(w_ref, b_ref, out_ref):
        # bf16 operands, f32 accumulation on the MXU, bias added in f32.
        y = jnp.dot(x, w_ref[...], preferred_element_type=jnp.float32)
        y = y + b_ref[...]                              # [Tn, hidden] f32
        y = y.astype(out_ref.dtype)                     # bf16 for downstream MXU
        # Static unroll over heads: re-layout once here instead of per KV step.
        for h in range(num_head):
            out_ref[h] = y[:, h * head_dim:(h + 1) * head_dim]

    project(wq_ref, bq_ref, q_ref)
    project(wk_ref, bk_ref, k_ref)
    project(wv_ref, bv_ref, v_ref)


# ---------------------------------------------------------------------------
# Kernel 2: flash attention over KV blocks (online softmax, f32 scratch).
# ---------------------------------------------------------------------------
def _flash_attn_kernel(q_ref, k_ref, v_ref, o_ref, m_sc, l_sc, acc_sc,
                       *, num_head, tk_blk, n_valid, scale):
    j = pl.program_id(1)

    @pl.when(j == 0)
    def _():
        m_sc[...] = jnp.full_like(m_sc, _NEG_INF)
        l_sc[...] = jnp.zeros_like(l_sc)
        acc_sc[...] = jnp.zeros_like(acc_sc)

    q = q_ref[...]                                      # [H, Tq, hd] bf16
    k = k_ref[...]                                      # [H, Tk, hd] bf16

    # Batched over heads, contracts head_dim of Q against head_dim of K
    # directly (no explicit transpose / XLU relayout).
    s = jnp.einsum("hqd,hkd->hqk", q, k,
                   preferred_element_type=jnp.float32) * scale  # [H, Tq, Tk] f32

    # Mask padded key columns of the last KV block.
    col = j * tk_blk + jax.lax.broadcasted_iota(jnp.int32, s.shape, 2)
    s = jnp.where(col < n_valid, s, _NEG_INF)

    # Online softmax update, all statistics in f32.
    m_prev = m_sc[...]
    m_new = jnp.maximum(m_prev, jnp.max(s, axis=-1, keepdims=True))
    alpha = jnp.exp(m_prev - m_new)
    p = jnp.exp(s - m_new)                              # [H, Tq, Tk] f32
    l_sc[...] = alpha * l_sc[...] + jnp.sum(p, axis=-1, keepdims=True)
    acc_sc[...] = alpha * acc_sc[...] + jnp.einsum(
        "hqk,hkd->hqd", p.astype(v_ref.dtype), v_ref[...],
        preferred_element_type=jnp.float32)
    m_sc[...] = m_new

    @pl.when(j == pl.num_programs(1) - 1)
    def _():
        inv_l = pl.reciprocal(l_sc[...], approx=True)   # EUP slot, ~free
        out = acc_sc[...] * inv_l                       # [H, Tq, hd] f32
        # One lane-dense [Tq, hidden] store (torch column order: head-major).
        parts = [out[h] for h in range(num_head)]
        o_ref[...] = jnp.concatenate(parts, axis=-1).astype(o_ref.dtype)


# ---------------------------------------------------------------------------
# Wrapper
# ---------------------------------------------------------------------------
def graph_multi_head_attention(node_emb, params, *, num_head):
    """node_emb: [N, D_in] float32. Returns [N, hidden_dim] float32."""
    wq, bq = params["q"]
    wk, bk = params["k"]
    wv, bv = params["v"]
    n, d_in = node_emb.shape
    hidden = wq.shape[1]
    assert hidden % num_head == 0
    head_dim = hidden // num_head

    # Node tile: 128 (MXU / lane aligned) for real sizes, sublane-aligned for
    # tiny inputs. These tiles keep double-buffered VMEM usage far below the
    # v7x 64 MiB ceiling.
    tile = 128 if n >= 128 else _round_up(n, 8)
    n_pad = _round_up(n, tile)
    grid_n = n_pad // tile

    x = node_emb
    if n_pad != n:
        x = jnp.pad(x, ((0, n_pad - n), (0, 0)))

    # bf16 MXU operands (halves HBM/VMEM traffic); f32 accumulation in-kernel.
    x_bf = x.astype(jnp.bfloat16)
    wq_bf = wq.astype(jnp.bfloat16)
    wk_bf = wk.astype(jnp.bfloat16)
    wv_bf = wv.astype(jnp.bfloat16)
    bq2 = bq.reshape(1, hidden).astype(jnp.float32)
    bk2 = bk.reshape(1, hidden).astype(jnp.float32)
    bv2 = bv.reshape(1, hidden).astype(jnp.float32)

    cparams = pltpu.CompilerParams(
        dimension_semantics=("parallel",),
        vmem_limit_bytes=48 * 1024 * 1024,
    )

    # ---- Kernel 1: QKV projection -> [H, N_pad, head_dim] bf16 ----
    w_spec = pl.BlockSpec((d_in, hidden), lambda i: (0, 0))
    b_spec = pl.BlockSpec((1, hidden), lambda i: (0, 0))
    qkv_out_spec = pl.BlockSpec((num_head, tile, head_dim), lambda i: (0, i, 0))
    proj = pl.pallas_call(
        functools.partial(_qkv_proj_kernel, num_head=num_head,
                          head_dim=head_dim),
        out_shape=(jax.ShapeDtypeStruct((num_head, n_pad, head_dim), jnp.bfloat16),
                   jax.ShapeDtypeStruct((num_head, n_pad, head_dim), jnp.bfloat16),
                   jax.ShapeDtypeStruct((num_head, n_pad, head_dim), jnp.bfloat16)),
        grid_spec=pltpu.PrefetchScalarGridSpec(
            num_scalar_prefetch=0,
            grid=(grid_n,),
            in_specs=[
                pl.BlockSpec((tile, d_in), lambda i: (i, 0)),
                w_spec, w_spec, w_spec,
                b_spec, b_spec, b_spec,
            ],
            out_specs=(qkv_out_spec, qkv_out_spec, qkv_out_spec),
        ),
        compiler_params=cparams,
    )
    q, k, v = proj(x_bf, wq_bf, wk_bf, wv_bf, bq2, bk2, bv2)

    # ---- Kernel 2: flash attention ----
    attn_cparams = pltpu.CompilerParams(
        dimension_semantics=("parallel", "arbitrary"),
        vmem_limit_bytes=48 * 1024 * 1024,
    )
    kv_spec = lambda: pl.BlockSpec((num_head, tile, head_dim),
                                   lambda i, j: (0, j, 0),
                                   pipeline_mode=pl.Buffered(2))
    attn = pl.pallas_call(
        functools.partial(_flash_attn_kernel, num_head=num_head, tk_blk=tile,
                          n_valid=n, scale=1.0 / math.sqrt(head_dim)),
        out_shape=jax.ShapeDtypeStruct((n_pad, hidden), jnp.float32),
        grid_spec=pltpu.PrefetchScalarGridSpec(
            num_scalar_prefetch=0,
            grid=(grid_n, grid_n),               # (q blocks, kv blocks) — kv last
            in_specs=[
                pl.BlockSpec((num_head, tile, head_dim), lambda i, j: (0, i, 0)),
                kv_spec(),
                kv_spec(),
            ],
            out_specs=pl.BlockSpec((tile, hidden), lambda i, j: (i, 0)),
            scratch_shapes=[
                pltpu.VMEM((num_head, tile, 1), jnp.float32),        # running max
                pltpu.VMEM((num_head, tile, 1), jnp.float32),        # running sum
                pltpu.VMEM((num_head, tile, head_dim), jnp.float32),  # accumulator
            ],
        ),
        compiler_params=attn_cparams,
    )
    out = attn(q, k, v)
    return out[:n]


# ---------------------------------------------------------------------------
# Parameter init (torch_geometric Linear, kaiming_uniform) and reference
# ---------------------------------------------------------------------------
def _kaiming_uniform(key, in_dim, out_dim):
    gain = math.sqrt(2.0 / (1.0 + 5.0))
    bound = gain * math.sqrt(3.0 / in_dim)
    # stored as [in_dim, out_dim] (pre-transposed relative to torch)
    return jax.random.uniform(key, (in_dim, out_dim), jnp.float32, -bound, bound)


def init_params(key, in_dim, hidden_dim):
    keys = jax.random.split(key, 6)
    bias_bound = 1.0 / math.sqrt(in_dim)
    params = {}
    for i, name in enumerate(("q", "k", "v")):
        w = _kaiming_uniform(keys[2 * i], in_dim, hidden_dim)
        b = jax.random.uniform(keys[2 * i + 1], (hidden_dim,), jnp.float32,
                               -bias_bound, bias_bound)
        params[name] = (w, b)
    return params


def _reference(node_emb, params, num_head):
    """Plain-JAX (f32) reference reproducing the PyTorch forward semantics."""
    wq, bq = params["q"]
    wk, bk = params["k"]
    wv, bv = params["v"]
    n = node_emb.shape[0]
    hidden_dim = wq.shape[1]
    head_dim = hidden_dim // num_head

    q = node_emb @ wq + bq
    k = node_emb @ wk + bk
    v = node_emb @ wv + bv
    q = q.reshape(n, num_head, head_dim).transpose(1, 0, 2)
    k = k.reshape(n, num_head, head_dim).transpose(1, 0, 2)
    v = v.reshape(n, num_head, head_dim).transpose(1, 0, 2)
    att = jnp.einsum("hnd,hmd->hnm", q, k) / math.sqrt(head_dim)
    att = jax.nn.softmax(att, axis=-1)
    out = jnp.einsum("hnm,hmd->hnd", att, v)
    out = out.transpose(1, 0, 2).reshape(n, hidden_dim)
    return out


if __name__ == "__main__":
    def run_case(n, hidden, num_head, case_idx):
        key = jax.random.fold_in(jax.random.PRNGKey(0), case_idx)
        k_x, k_p = jax.random.split(key)
        node_emb = jax.random.normal(k_x, (n, hidden), jnp.float32)
        params = init_params(k_p, hidden, hidden)

        out = graph_multi_head_attention(node_emb, params, num_head=num_head)
        out = jax.block_until_ready(out)

        ref = _reference(node_emb, params, num_head)
        assert out.shape == (n, hidden)
        err = float(jnp.max(jnp.abs(out - ref)))
        assert err < 3e-2, f"mismatch vs reference (max abs err {err})"

    # Small single-tile case (matches module defaults: N=8, hidden=32, 4 heads).
    run_case(8, 32, 4, 0)
    # Multi-block flash path with a padded last KV block (exercises masking).
    run_case(160, 64, 4, 1)

    # TODO(synk): self.out_linear is defined in __init__ but never applied in
    # the reference forward(), so it is intentionally omitted here.
    print("KERNEL_OK")
</pallas_src>

<mosaic_0001>
module attributes {stable_mosaic.version = 11 : i64} {
  func.func @_qkv_proj_kernel(%arg0: i32, %arg1: memref<8x32xbf16, #tpu.memory_space<vmem>>, %arg2: memref<32x32xbf16, #tpu.memory_space<vmem>>, %arg3: memref<32x32xbf16, #tpu.memory_space<vmem>>, %arg4: memref<32x32xbf16, #tpu.memory_space<vmem>>, %arg5: memref<1x32xf32, #tpu.memory_space<vmem>>, %arg6: memref<1x32xf32, #tpu.memory_space<vmem>>, %arg7: memref<1x32xf32, #tpu.memory_space<vmem>>, %arg8: memref<4x8x8xbf16, #tpu.memory_space<vmem>>, %arg9: memref<4x8x8xbf16, #tpu.memory_space<vmem>>, %arg10: memref<4x8x8xbf16, #tpu.memory_space<vmem>>) attributes {dimension_semantics = [#tpu.dimension_semantics<parallel>], iteration_bounds = array<i64: 1>, scalar_prefetch = 0 : i64, scratch_operands = 0 : i64, tpu.core_type = #tpu.core_type<tc>, window_params = [{transform_indices = @transform_0, window_bounds = array<i64: 8, 32>}, {pipeline_mode = #tpu.pipeline_mode<synchronous>, transform_indices = @transform_1, window_bounds = array<i64: 32, 32>}, {pipeline_mode = #tpu.pipeline_mode<synchronous>, transform_indices = @transform_2, window_bounds = array<i64: 32, 32>}, {pipeline_mode = #tpu.pipeline_mode<synchronous>, transform_indices = @transform_3, window_bounds = array<i64: 32, 32>}, {pipeline_mode = #tpu.pipeline_mode<synchronous>, transform_indices = @transform_4, window_bounds = array<i64: 1, 32>}, {pipeline_mode = #tpu.pipeline_mode<synchronous>, transform_indices = @transform_5, window_bounds = array<i64: 1, 32>}, {pipeline_mode = #tpu.pipeline_mode<synchronous>, transform_indices = @transform_6, window_bounds = array<i64: 1, 32>}, {transform_indices = @transform_7, window_bounds = array<i64: 4, 8, 8>}, {transform_indices = @transform_8, window_bounds = array<i64: 4, 8, 8>}, {transform_indices = @transform_9, window_bounds = array<i64: 4, 8, 8>}]} {
    %c0 = arith.constant 0 : index
    %c0_0 = arith.constant 0 : index
    %0 = vector.load %arg1[%c0, %c0_0] : memref<8x32xbf16, #tpu.memory_space<vmem>>, vector<8x32xbf16>
    %c0_1 = arith.constant 0 : index
    %c0_2 = arith.constant 0 : index
    %1 = vector.load %arg2[%c0_1, %c0_2] : memref<32x32xbf16, #tpu.memory_space<vmem>>, vector<32x32xbf16>
    %cst = arith.constant dense<0.000000e+00> : vector<8x32xf32>
    %2 = tpu.matmul %0, %1, %cst {dimension_numbers = #tpu.dot_dimension_numbers<[1], [0], [0], [1], [0, 0, 1, 1], [], []>} : vector<8x32xbf16>, vector<32x32xbf16>, vector<8x32xf32> -> vector<8x32xf32>
    %c0_3 = arith.constant 0 : index
    %c0_4 = arith.constant 0 : index
    %3 = vector.load %arg5[%c0_3, %c0_4] : memref<1x32xf32, #tpu.memory_space<vmem>>, vector<1x32xf32>
    %4 = vector.broadcast %3 : vector<1x32xf32> to vector<8x32xf32>
    %5 = arith.addf %2, %4 : vector<8x32xf32>
    %6 = arith.truncf %5 : vector<8x32xf32> to vector<8x32xbf16>
    %7 = vector.extract_strided_slice %6 {offsets = [0, 0], sizes = [8, 8], strides = [1, 1]} : vector<8x32xbf16> to vector<8x8xbf16>
    %c0_5 = arith.constant 0 : index
    %c0_6 = arith.constant 0 : index
    %c0_7 = arith.constant 0 : index
    %8 = vector.load %arg8[%c0_5, %c0_6, %c0_7] : memref<4x8x8xbf16, #tpu.memory_space<vmem>>, vector<1x8x8xbf16>
    %9 = vector.shape_cast %8 : vector<1x8x8xbf16> to vector<8x8xbf16>
    %10 = vector.shape_cast %7 : vector<8x8xbf16> to vector<1x8x8xbf16>
    tpu.vector_store %arg8[%c0_5, %c0_6, %c0_7], %10 {strides = array<i32>} : memref<4x8x8xbf16, #tpu.memory_space<vmem>>, vector<1x8x8xbf16>,
    %11 = vector.extract_strided_slice %6 {offsets = [0, 8], sizes = [8, 8], strides = [1, 1]} : vector<8x32xbf16> to vector<8x8xbf16>
    %c1 = arith.constant 1 : index
    %c0_8 = arith.constant 0 : index
    %c0_9 = arith.constant 0 : index
    %12 = vector.load %arg8[%c1, %c0_8, %c0_9] : memref<4x8x8xbf16, #tpu.memory_space<vmem>>, vector<1x8x8xbf16>
    %13 = vector.shape_cast %12 : vector<1x8x8xbf16> to vector<8x8xbf16>
    %14 = vector.shape_cast %11 : vector<8x8xbf16> to vector<1x8x8xbf16>
    tpu.vector_store %arg8[%c1, %c0_8, %c0_9], %14 {strides = array<i32>} : memref<4x8x8xbf16, #tpu.memory_space<vmem>>, vector<1x8x8xbf16>,
    %15 = vector.extract_strided_slice %6 {offsets = [0, 16], sizes = [8, 8], strides = [1, 1]} : vector<8x32xbf16> to vector<8x8xbf16>
    %c2 = arith.constant 2 : index
    %c0_10 = arith.constant 0 : index
    %c0_11 = arith.constant 0 : index
    %16 = vector.load %arg8[%c2, %c0_10, %c0_11] : memref<4x8x8xbf16, #tpu.memory_space<vmem>>, vector<1x8x8xbf16>
    %17 = vector.shape_cast %16 : vector<1x8x8xbf16> to vector<8x8xbf16>
    %18 = vector.shape_cast %15 : vector<8x8xbf16> to vector<1x8x8xbf16>
    tpu.vector_store %arg8[%c2, %c0_10, %c0_11], %18 {strides = array<i32>} : memref<4x8x8xbf16, #tpu.memory_space<vmem>>, vector<1x8x8xbf16>,
    %19 = vector.extract_strided_slice %6 {offsets = [0, 24], sizes = [8, 8], strides = [1, 1]} : vector<8x32xbf16> to vector<8x8xbf16>
    %c3 = arith.constant 3 : index
    %c0_12 = arith.constant 0 : index
    %c0_13 = arith.constant 0 : index
    %20 = vector.load %arg8[%c3, %c0_12, %c0_13] : memref<4x8x8xbf16, #tpu.memory_space<vmem>>, vector<1x8x8xbf16>
    %21 = vector.shape_cast %20 : vector<1x8x8xbf16> to vector<8x8xbf16>
    %22 = vector.shape_cast %19 : vector<8x8xbf16> to vector<1x8x8xbf16>
    tpu.vector_store %arg8[%c3, %c0_12, %c0_13], %22 {strides = array<i32>} : memref<4x8x8xbf16, #tpu.memory_space<vmem>>, vector<1x8x8xbf16>,
    %c0_14 = arith.constant 0 : index
    %c0_15 = arith.constant 0 : index
    %23 = vector.load %arg3[%c0_14, %c0_15] : memref<32x32xbf16, #tpu.memory_space<vmem>>, vector<32x32xbf16>
    %cst_16 = arith.constant dense<0.000000e+00> : vector<8x32xf32>
    %24 = tpu.matmul %0, %23, %cst_16 {dimension_numbers = #tpu.dot_dimension_numbers<[1], [0], [0], [1], [0, 0, 1, 1], [], []>} : vector<8x32xbf16>, vector<32x32xbf16>, vector<8x32xf32> -> vector<8x32xf32>
    %c0_17 = arith.constant 0 : index
    %c0_18 = arith.constant 0 : index
    %25 = vector.load %arg6[%c0_17, %c0_18] : memref<1x32xf32, #tpu.memory_space<vmem>>, vector<1x32xf32>
    %26 = vector.broadcast %25 : vector<1x32xf32> to vector<8x32xf32>
    %27 = arith.addf %24, %26 : vector<8x32xf32>
    %28 = arith.truncf %27 : vector<8x32xf32> to vector<8x32xbf16>
    %29 = vector.extract_strided_slice %28 {offsets = [0, 0], sizes = [8, 8], strides = [1, 1]} : vector<8x32xbf16> to vector<8x8xbf16>
    %c0_19 = arith.constant 0 : index
    %c0_20 = arith.constant 0 : index
    %c0_21 = arith.constant 0 : index
    %30 = vector.load %arg9[%c0_19, %c0_20, %c0_21] : memref<4x8x8xbf16, #tpu.memory_space<vmem>>, vector<1x8x8xbf16>
    %31 = vector.shape_cast %30 : vector<1x8x8xbf16> to vector<8x8xbf16>
    %32 = vector.shape_cast %29 : vector<8x8xbf16> to vector<1x8x8xbf16>
    tpu.vector_store %arg9[%c0_19, %c0_20, %c0_21], %32 {strides = array<i32>} : memref<4x8x8xbf16, #tpu.memory_space<vmem>>, vector<1x8x8xbf16>,
    %33 = vector.extract_strided_slice %28 {offsets = [0, 8], sizes = [8, 8], strides = [1, 1]} : vector<8x32xbf16> to vector<8x8xbf16>
    %c1_22 = arith.constant 1 : index
    %c0_23 = arith.constant 0 : index
    %c0_24 = arith.constant 0 : index
    %34 = vector.load %arg9[%c1_22, %c0_23, %c0_24] : memref<4x8x8xbf16, #tpu.memory_space<vmem>>, vector<1x8x8xbf16>
    %35 = vector.shape_cast %34 : vector<1x8x8xbf16> to vector<8x8xbf16>
    %36 = vector.shape_cast %33 : vector<8x8xbf16> to vector<1x8x8xbf16>
    tpu.vector_store %arg9[%c1_22, %c0_23, %c0_24], %36 {strides = array<i32>} : memref<4x8x8xbf16, #tpu.memory_space<vmem>>, vector<1x8x8xbf16>,
    %37 = vector.extract_strided_slice %28 {offsets = [0, 16], sizes = [8, 8], strides = [1, 1]} : vector<8x32xbf16> to vector<8x8xbf16>
    %c2_25 = arith.constant 2 : index
    %c0_26 = arith.constant 0 : index
    %c0_27 = arith.constant 0 : index
    %38 = vector.load %arg9[%c2_25, %c0_26, %c0_27] : memref<4x8x8xbf16, #tpu.memory_space<vmem>>, vector<1x8x8xbf16>
    %39 = vector.shape_cast %38 : vector<1x8x8xbf16> to vector<8x8xbf16>
    %40 = vector.shape_cast %37 : vector<8x8xbf16> to vector<1x8x8xbf16>
    tpu.vector_store %arg9[%c2_25, %c0_26, %c0_27], %40 {strides = array<i32>} : memref<4x8x8xbf16, #tpu.memory_space<vmem>>, vector<1x8x8xbf16>,
    %41 = vector.extract_strided_slice %28 {offsets = [0, 24], sizes = [8, 8], strides = [1, 1]} : vector<8x32xbf16> to vector<8x8xbf16>
    %c3_28 = arith.constant 3 : index
    %c0_29 = arith.constant 0 : index
    %c0_30 = arith.constant 0 : index
    %42 = vector.load %arg9[%c3_28, %c0_29, %c0_30] : memref<4x8x8xbf16, #tpu.memory_space<vmem>>, vector<1x8x8xbf16>
    %43 = vector.shape_cast %42 : vector<1x8x8xbf16> to vector<8x8xbf16>
    %44 = vector.shape_cast %41 : vector<8x8xbf16> to vector<1x8x8xbf16>
    tpu.vector_store %arg9[%c3_28, %c0_29, %c0_30], %44 {strides = array<i32>} : memref<4x8x8xbf16, #tpu.memory_space<vmem>>, vector<1x8x8xbf16>,
    %c0_31 = arith.constant 0 : index
    %c0_32 = arith.constant 0 : index
    %45 = vector.load %arg4[%c0_31, %c0_32] : memref<32x32xbf16, #tpu.memory_space<vmem>>, vector<32x32xbf16>
    %cst_33 = arith.constant dense<0.000000e+00> : vector<8x32xf32>
    %46 = tpu.matmul %0, %45, %cst_33 {dimension_numbers = #tpu.dot_dimension_numbers<[1], [0], [0], [1], [0, 0, 1, 1], [], []>} : vector<8x32xbf16>, vector<32x32xbf16>, vector<8x32xf32> -> vector<8x32xf32>
    %c0_34 = arith.constant 0 : index
    %c0_35 = arith.constant 0 : index
    %47 = vector.load %arg7[%c0_34, %c0_35] : memref<1x32xf32, #tpu.memory_space<vmem>>, vector<1x32xf32>
    %48 = vector.broadcast %47 : vector<1x32xf32> to vector<8x32xf32>
    %49 = arith.addf %46, %48 : vector<8x32xf32>
    %50 = arith.truncf %49 : vector<8x32xf32> to vector<8x32xbf16>
    %51 = vector.extract_strided_slice %50 {offsets = [0, 0], sizes = [8, 8], strides = [1, 1]} : vector<8x32xbf16> to vector<8x8xbf16>
    %c0_36 = arith.constant 0 : index
    %c0_37 = arith.constant 0 : index
    %c0_38 = arith.constant 0 : index
    %52 = vector.load %arg10[%c0_36, %c0_37, %c0_38] : memref<4x8x8xbf16, #tpu.memory_space<vmem>>, vector<1x8x8xbf16>
    %53 = vector.shape_cast %52 : vector<1x8x8xbf16> to vector<8x8xbf16>
    %54 = vector.shape_cast %51 : vector<8x8xbf16> to vector<1x8x8xbf16>
    tpu.vector_store %arg10[%c0_36, %c0_37, %c0_38], %54 {strides = array<i32>} : memref<4x8x8xbf16, #tpu.memory_space<vmem>>, vector<1x8x8xbf16>,
    %55 = vector.extract_strided_slice %50 {offsets = [0, 8], sizes = [8, 8], strides = [1, 1]} : vector<8x32xbf16> to vector<8x8xbf16>
    %c1_39 = arith.constant 1 : index
    %c0_40 = arith.constant 0 : index
    %c0_41 = arith.constant 0 : index
    %56 = vector.load %arg10[%c1_39, %c0_40, %c0_41] : memref<4x8x8xbf16, #tpu.memory_space<vmem>>, vector<1x8x8xbf16>
    %57 = vector.shape_cast %56 : vector<1x8x8xbf16> to vector<8x8xbf16>
    %58 = vector.shape_cast %55 : vector<8x8xbf16> to vector<1x8x8xbf16>
    tpu.vector_store %arg10[%c1_39, %c0_40, %c0_41], %58 {strides = array<i32>} : memref<4x8x8xbf16, #tpu.memory_space<vmem>>, vector<1x8x8xbf16>,
    %59 = vector.extract_strided_slice %50 {offsets = [0, 16], sizes = [8, 8], strides = [1, 1]} : vector<8x32xbf16> to vector<8x8xbf16>
    %c2_42 = arith.constant 2 : index
    %c0_43 = arith.constant 0 : index
    %c0_44 = arith.constant 0 : index
    %60 = vector.load %arg10[%c2_42, %c0_43, %c0_44] : memref<4x8x8xbf16, #tpu.memory_space<vmem>>, vector<1x8x8xbf16>
    %61 = vector.shape_cast %60 : vector<1x8x8xbf16> to vector<8x8xbf16>
    %62 = vector.shape_cast %59 : vector<8x8xbf16> to vector<1x8x8xbf16>
    tpu.vector_store %arg10[%c2_42, %c0_43, %c0_44], %62 {strides = array<i32>} : memref<4x8x8xbf16, #tpu.memory_space<vmem>>, vector<1x8x8xbf16>,
    %63 = vector.extract_strided_slice %50 {offsets = [0, 24], sizes = [8, 8], strides = [1, 1]} : vector<8x32xbf16> to vector<8x8xbf16>
    %c3_45 = arith.constant 3 : index
    %c0_46 = arith.constant 0 : index
    %c0_47 = arith.constant 0 : index
    %64 = vector.load %arg10[%c3_45, %c0_46, %c0_47] : memref<4x8x8xbf16, #tpu.memory_space<vmem>>, vector<1x8x8xbf16>
    %65 = vector.shape_cast %64 : vector<1x8x8xbf16> to vector<8x8xbf16>
    %66 = vector.shape_cast %63 : vector<8x8xbf16> to vector<1x8x8xbf16>
    tpu.vector_store %arg10[%c3_45, %c0_46, %c0_47], %66 {strides = array<i32>} : memref<4x8x8xbf16, #tpu.memory_space<vmem>>, vector<1x8x8xbf16>,
    return
  }
  func.func @transform_0(%arg0: i32) -> (i32, i32) {
    %c0_i32 = arith.constant 0 : i32
    %c0_i32_0 = arith.constant 0 : i32
    return %arg0, %c0_i32 : i32, i32
  }
  func.func @transform_1(%arg0: i32) -> (i32, i32) {
    %c0_i32 = arith.constant 0 : i32
    %c0_i32_0 = arith.constant 0 : i32
    %c0_i32_1 = arith.constant 0 : i32
    return %c0_i32, %c0_i32_0 : i32, i32
  }
  func.func @transform_2(%arg0: i32) -> (i32, i32) {
    %c0_i32 = arith.constant 0 : i32
    %c0_i32_0 = arith.constant 0 : i32
    %c0_i32_1 = arith.constant 0 : i32
    return %c0_i32, %c0_i32_0 : i32, i32
  }
  func.func @transform_3(%arg0: i32) -> (i32, i32) {
    %c0_i32 = arith.constant 0 : i32
    %c0_i32_0 = arith.constant 0 : i32
    %c0_i32_1 = arith.constant 0 : i32
    return %c0_i32, %c0_i32_0 : i32, i32
  }
  func.func @transform_4(%arg0: i32) -> (i32, i32) {
    %c0_i32 = arith.constant 0 : i32
    %c0_i32_0 = arith.constant 0 : i32
    %c0_i32_1 = arith.constant 0 : i32
    return %c0_i32, %c0_i32_0 : i32, i32
  }
  func.func @transform_5(%arg0: i32) -> (i32, i32) {
    %c0_i32 = arith.constant 0 : i32
    %c0_i32_0 = arith.constant 0 : i32
    %c0_i32_1 = arith.constant 0 : i32
    return %c0_i32, %c0_i32_0 : i32, i32
  }
  func.func @transform_6(%arg0: i32) -> (i32, i32) {
    %c0_i32 = arith.constant 0 : i32
    %c0_i32_0 = arith.constant 0 : i32
    %c0_i32_1 = arith.constant 0 : i32
    return %c0_i32, %c0_i32_0 : i32, i32
  }
  func.func @transform_7(%arg0: i32) -> (i32, i32, i32) {
    %c0_i32 = arith.constant 0 : i32
    %c0_i32_0 = arith.constant 0 : i32
    %c0_i32_1 = arith.constant 0 : i32
    return %c0_i32, %arg0, %c0_i32_0 : i32, i32, i32
  }
  func.func @transform_8(%arg0: i32) -> (i32, i32, i32) {
    %c0_i32 = arith.constant 0 : i32
    %c0_i32_0 = arith.constant 0 : i32
    %c0_i32_1 = arith.constant 0 : i32
    return %c0_i32, %arg0, %c0_i32_0 : i32, i32, i32
  }
  func.func @transform_9(%arg0: i32) -> (i32, i32, i32) {
    %c0_i32 = arith.constant 0 : i32
    %c0_i32_0 = arith.constant 0 : i32
    %c0_i32_1 = arith.constant 0 : i32
    return %c0_i32, %arg0, %c0_i32_0 : i32, i32, i32
  }
}

</mosaic_0001>

<bundles_post_ra>
// kernel: tpu_custom_call.1
= control target key start
LH: loop header
LB: loop body
LE: loop exit
PB: predicated region body
PF: predicated region fallthrough
CT: control target
= control target key end

     0   :  { %15 = vsyncpa [#allocation3], 0  ;;  %s815_s0 = inlined_call_operand.hbm [shape: bf16[8,32], index: 0, kind: input, shape index: {}]   ;;  %s816_s1 = inlined_call_operand.hbm [shape: bf16[32,32], index: 1, kind: input, shape index: {}]   ;;  %s817_s2 = inlined_call_operand.hbm [shape: bf16[32,32], index: 2, kind: input, shape index: {}]   ;;  %s818_s3 = inlined_call_operand.hbm [shape: bf16[32,32], index: 3, kind: input, shape index: {}]   ;;  %s819_s4 = inlined_call_operand.vmem [shape: f32[1,32], index: 4, kind: input, shape index: {}]   ;;  %s820_s5 = inlined_call_operand.vmem [shape: f32[1,32], index: 5, kind: input, shape index: {}]   ;;  %s821_s6 = inlined_call_operand.vmem [shape: f32[1,32], index: 6, kind: input, shape index: {}]   ;;  %s822_s7 = inlined_call_operand.hbm [shape: bf16[4,8,8], index: 7, kind: output, shape index: {0}]   ;;  %s823_s8 = inlined_call_operand.hbm [shape: bf16[4,8,8], index: 8, kind: output, shape index: {1}]   ;;  %s824_s9 = inlined_call_operand.hbm [shape: bf16[4,8,8], index: 9, kind: output, shape index: {2}]  }
   0x1   :  { %16 = vsyncpa [#allocation6], 0 }
   0x2   :  { %17 = vsyncpa [#allocation9], 0 }
   0x3   :  { %18 = vsyncpa [#allocation4], 0 }
   0x4   :  { %19 = vsyncpa [#allocation12], 0  ;;  %s625_s30 = smov [#allocation5]   ;;  %s461_s13 = scalar_lea.hbm %s816_s1, 256 }
   0x5   :  { %s35_s10 = sshll.u32 %s625_s30, 4  ;;  %p462_p0 = scmp.ne.s32.totalorder %s816_s1, %s461_s13  ;;  %s36_s10 = int_to_ptr.vmem [resolvable:$true] %s35_s10 }
   0x6   :  { %p465_p1 = scmp.lt.u32.totalorder %s461_s13, %s816_s1 }
   0x8   :  { %p467_p2 = pnand %p465_p1, %p462_p0 }
   0xa   :  { %470 = shalt.err (!%p467_p2)
}
   0xb   :  { %s471_s18 = scalar_lea.vmem %s36_s10, 256  ;;  %p476_p4 = scmp.lt.s32.totalorder %s36_s10, %s36_s10 }
   0xc   :  { %p472_p3 = scmp.ne.s32.totalorder %s36_s10, %s471_s18  ;;  %p477_p5 = scmp.lt.s32.totalorder %s471_s18, %s471_s18 }
   0xe   :  { %p478_p6 = por %p477_p5, %p476_p4 }
  0x10   :  { %p479_p7 = pnand %p478_p6, %p472_p3 }
  0x12   :  { %482 = shalt.err (!%p479_p7)
}
  0x13   :  { %s626_s19 = smov 64   ;;  %s627_s20 = smov 4  }
  0x14   :  { %41 = dma.hbm_to_vmem [thread:$0]  %s816_s1, 256, %s36_s10, [#allocation6], %s626_s19, %s626_s19, %s627_s20  }
  0x15   :  { %s628_s23 = smov [#allocation2]   ;;  %s629_s25 = smov [#allocation7]  }
  0x16   :  { %s26_s24 = sshll.u32 %s628_s23, 4  ;;  %s47_s26 = sshll.u32 %s629_s25, 4  ;;  %s27_s24 = int_to_ptr.vmem [resolvable:$true] %s26_s24  ;;  %s48_s26 = int_to_ptr.vmem [resolvable:$true] %s47_s26 }
  0x17   :  { %s483_s29 = scalar_lea.hbm %s815_s0, 64 }
  0x18   :  { %p484_p8 = scmp.ne.s32.totalorder %s815_s0, %s483_s29  ;;  %p487_p9 = scmp.lt.u32.totalorder %s483_s29, %s815_s0 }
  0x1a   :  { %p489_p10 = pnand %p487_p9, %p484_p8 }
  0x1c   :  { %492 = shalt.err (!%p489_p10)
}
  0x1d   :  { %s493_s1 = scalar_lea.vmem %s27_s24, 64  ;;  %p498_p12 = scmp.lt.s32.totalorder %s27_s24, %s27_s24 }
  0x1e   :  { %p494_p11 = scmp.ne.s32.totalorder %s27_s24, %s493_s1  ;;  %p499_p13 = scmp.lt.s32.totalorder %s493_s1, %s493_s1 }
  0x20   :  { %p500_p0 = por %p499_p13, %p498_p12 }
  0x22   :  { %p501_p1 = pnand %p500_p0, %p494_p11 }
  0x24   :  { %504 = shalt.err (!%p501_p1)
}
  0x25   :  { %29 = dma.hbm_to_vmem [thread:$0]  %s815_s0, 64, %s27_s24, [#allocation3]  }
  0x26   :  { %s505_s17 = scalar_lea.hbm %s817_s2, 256 }
  0x27   :  { %p506_p2 = scmp.ne.s32.totalorder %s817_s2, %s505_s17  ;;  %p509_p3 = scmp.lt.u32.totalorder %s505_s17, %s817_s2 }
  0x29   :  { %p511_p4 = pnand %p509_p3, %p506_p2 }
  0x2b   :  { %514 = shalt.err (!%p511_p4)
}
  0x2c   :  { %s515_s25 = scalar_lea.vmem %s48_s26, 256  ;;  %p520_p6 = scmp.lt.s32.totalorder %s48_s26, %s48_s26 }
  0x2d   :  { %p516_p5 = scmp.ne.s32.totalorder %s48_s26, %s515_s25  ;;  %p521_p7 = scmp.lt.s32.totalorder %s515_s25, %s515_s25 }
  0x2f   :  { %p522_p8 = por %p521_p7, %p520_p6 }
  0x31   :  { %p523_p9 = pnand %p522_p8, %p516_p5 }
  0x33   :  { %526 = shalt.err (!%p523_p9)
}
  0x34   :  { %53 = dma.hbm_to_vmem [thread:$0]  %s817_s2, 256, %s48_s26, [#allocation6], %s626_s19, %s626_s19, %s627_s20  }
  0x35   :  { %s630_s27 = smov [#allocation8]   ;;  %s527_s11 = scalar_lea.hbm %s818_s3, 256 }
  0x36   :  { %s59_s28 = sshll.u32 %s630_s27, 4  ;;  %p528_p10 = scmp.ne.s32.totalorder %s818_s3, %s527_s11  ;;  %s60_s28 = int_to_ptr.vmem [resolvable:$true] %s59_s28 }
  0x37   :  { %p531_p11 = scmp.lt.u32.totalorder %s527_s11, %s818_s3 }
  0x39   :  { %p533_p12 = pnand %p531_p11, %p528_p10 }
  0x3b   :  { %536 = shalt.err (!%p533_p12)
}
  0x3c   :  { %s537_s14 = scalar_lea.vmem %s60_s28, 256  ;;  %p542_p0 = scmp.lt.s32.totalorder %s60_s28, %s60_s28 }
  0x3d   :  { %p538_p13 = scmp.ne.s32.totalorder %s60_s28, %s537_s14  ;;  %p543_p1 = scmp.lt.s32.totalorder %s537_s14, %s537_s14 }
  0x3f   :  { %p544_p2 = por %p543_p1, %p542_p0 }
  0x41   :  { %p545_p3 = pnand %p544_p2, %p538_p13 }
  0x43   :  { %548 = shalt.err (!%p545_p3)
}
  0x44   :  { %65 = dma.hbm_to_vmem [thread:$0]  %s818_s3, 256, %s60_s28, [#allocation9], %s626_s19, %s626_s19, %s627_s20  }
  0x45   :  { %615 = dma.done.wait [#allocation3], 64  }
  0x46   :  { %616 = vsyncadd [#allocation3], 4294967232 }
  0x47   :  { %617 = dma.done.wait [#allocation6], 512  }
  0x48   :  { %618 = vsyncadd [#allocation6], 4294966784 }
  0x49   :  { %619 = dma.done.wait [#allocation9], 256  }
  0x4a   :  { %620 = vsyncadd [#allocation9], 4294967040  ;;  %v631_v0 = vmov 0.0   ;;  %vm632_vm0 = vmmov 0   ;;  %v455_v1 = vld [vmem:[#allocation7] sm:$0xff]   ;;  %v456_v2 = vld [vmem:[#allocation5] sm:$0xff]  }
  0x4b   :  { %425 = vmatprep.subr.bf16.mxu1 %v631_v0  ;;  %417 = vmatprep.subr.bf16.mxu0 %v631_v0  ;;  %v457_v3 = vld [vmem:[#allocation7 + $0x8] sm:$0xff]   ;;  %v458_v4 = vld [vmem:[#allocation5 + $0x8] sm:$0xff]   ;;  %vm109_vm1 = vcmask 261120   ;;  %v459_v6 = vld [vmem:[#allocation8] sm:$0xff]   ;;  %vm154_vm2 = vcmask 60416   ;;  %s633_s18 = smov 104  }
  0x4c   :  { %429 = vmatprep.mubr.msk.bf16.mxu1 %vm632_vm0, %v631_v0  ;;  %421 = vmatprep.mubr.msk.bf16.mxu0 %vm632_vm0, %v631_v0  ;;  %v85_v5 = vld [vmem:[#allocation2] sm:$0xf]  ;;  %v460_v7 = vld [vmem:[#allocation8 + $0x8] sm:$0xff]   ;;  %s635_s22 = smov 112   ;;  %s636_s23 = smov [#allocation11]  }
  0x4d   :  { %426 = vmatpush3.bf16.msra.mxu1 %v455_v1  ;;  %418 = vmatpush3.bf16.msra.mxu0 %v456_v2  ;;  %v395_v8 = vld [vmem:[%s820_s5] ss:$0 sm:$0xff]  ;;  %s634_s5 = smov 120   ;;  %s637_s25 = smov [#allocation10]  }
  0x4e   :  { %427 = vmatprep.subr.bf16.mxu1 %v631_v0  ;;  %419 = vmatprep.subr.bf16.mxu0 %v631_v0  ;;  %v390_v9 = vld [vmem:[%s819_s4] ss:$0 sm:$0xff]  ;;  %s345_s0 = sshll.u32 %s637_s25, 4  ;;  %s346_s0 = int_to_ptr.vmem [resolvable:$true] %s345_s0 }
  0x4f   :  { %v400_v22 = vld [vmem:[%s821_s6] ss:$0 sm:$0xff]  ;;  %s357_s6 = sshll.u32 %s636_s23, 4  ;;  %s358_s6 = int_to_ptr.vmem [resolvable:$true] %s357_s6 }
  0x50   :  { %s549_s24 = scalar_lea.vmem %s358_s6, 256  ;;  %p554_p5 = scmp.lt.s32.totalorder %s358_s6, %s358_s6 }
  0x51   :  { %428 = vmatpush3.bf16.msra.mxu1 %v457_v3  ;;  %420 = vmatpush3.bf16.msra.mxu0 %v458_v4  ;;  %p550_p4 = scmp.ne.s32.totalorder %s358_s6, %s549_s24  ;;  %p555_p6 = scmp.lt.s32.totalorder %s549_s24, %s549_s24 }
  0x52   :  { %433 = vmatprep.subr.bf16.mxu0 %v631_v0 }
  0x53   :  { %p556_p7 = por %p555_p6, %p554_p5 }
  0x54   :  { %430 = vmatmul.mubr.msk.bf16.vlgmr.msra.gmra.mrb[0].mxu1 %vm109_vm1, %v85_v5  ;;  %422 = vmatmul.mubr.msk.bf16.vlgmr.msra.gmra.mrb[0].mxu0 %vm109_vm1, %v85_v5 }
  0x55   :  { %434 = vmatpush3.bf16.msra.mxu0 %v459_v6  ;;  %437 = vmatprep.mubr.msk.bf16.mxu0 %vm632_vm0, %v631_v0  ;;  %p557_p8 = pnand %p556_p7, %p550_p4 }
  0x56   :  { %435 = vmatprep.subr.bf16.mxu0 %v631_v0 }
  0x59   :  { %436 = vmatpush3.bf16.msra.mxu0 %v460_v7 }
  0x5c   :  { %438 = vmatmul.mubr.msk.bf16.vlgmr.msra.gmra.mrb[4].mxu0 %vm109_vm1, %v85_v5 }
 0x127   :  { %v231_v10 = vpop.f32.mrb[0].mxu1  ;;  %v147_v12 = vpop.f32.mrb[0].mxu0 }
 0x128   :  { %v232_v11 = vadd.f32 %v395_v8, %v231_v10  ;;  %v431_v13 = vpop.f32.mrb[1].mxu1  ;;  %v148_v14 = vadd.f32 %v390_v9, %v147_v12  ;;  %v423_v15 = vpop.f32.mrb[1].mxu0 }
 0x129   :  { %v234_v16 = vpop.f32.mrb[2].mxu1  ;;  %v150_v18 = vpop.f32.mrb[2].mxu0 }
 0x12a   :  { %v237_v17 = vpack.c.bf16 %v232_v11, %v232_v11  ;;  %v432_v19 = vpop.f32.mrb[3].mxu1  ;;  %v153_v20 = vpack.c.bf16 %v148_v14, %v148_v14  ;;  %v424_v21 = vpop.f32.mrb[3].mxu0 }
 0x12c   :  { %252 = vrot.lane.b32.xlu1 %v237_v17, %s633_s18  ;;  %242 = vrot.lane.b32.xlu0 %v237_v17, %s634_s5  ;;  %238 = vst.msk [vmem:[#allocation11] sm:$0xf] %vm154_vm2, %v237_v17  ;;  %155 = vst.msk [vmem:[#allocation10] sm:$0xf] %vm154_vm2, %v153_v20 }
 0x12f   :  { %v314_v23 = vpop.f32.mrb[4].mxu0 }
 0x130   :  { %247 = vrot.lane.b32.xlu0 %v237_v17, %s635_s22  ;;  %159 = vrot.lane.b32.xlu1 %v153_v20, %s634_s5  ;;  %v315_v24 = vadd.f32 %v400_v22, %v314_v23  ;;  %v439_v25 = vpop.f32.mrb[5].mxu0 }
 0x131   :  { %v317_v26 = vpop.f32.mrb[6].mxu0 }
 0x132   :  { %v320_v27 = vpack.c.bf16 %v315_v24, %v315_v24  ;;  %v440_v28 = vpop.f32.mrb[7].mxu0 }
 0x134   :  { %164 = vrot.lane.b32.xlu0 %v153_v20, %s635_s22  ;;  %169 = vrot.lane.b32.xlu1 %v153_v20, %s633_s18  ;;  %321 = vst.msk [vmem:[#allocation13] sm:$0xf] %vm154_vm2, %v320_v27 }
 0x138   :  { %330 = vrot.lane.b32.xlu1 %v320_v27, %s635_s22  ;;  %325 = vrot.lane.b32.xlu0 %v320_v27, %s634_s5 }
 0x13c   :  { %335 = vrot.lane.b32.xlu0 %v320_v27, %s633_s18 }
 0x19e   :  { %v253_v29 = vpop.permute.xlu1 %252  ;;  %v243_v30 = vpop.permute.xlu0 %242 }
 0x19f   :  { %256 = vst.msk [vmem:[#allocation11 + $0xc] sm:$0xf] %vm154_vm2, %v253_v29  ;;  %246 = vst.msk [vmem:[#allocation11 + $0x4] sm:$0xf] %vm154_vm2, %v243_v30 }
 0x1a2   :  { %v248_v31 = vpop.permute.xlu0 %247  ;;  %v160_v32 = vpop.permute.xlu1 %159 }
 0x1a3   :  { %251 = vst.msk [vmem:[#allocation11 + $0x8] sm:$0xf] %vm154_vm2, %v248_v31  ;;  %163 = vst.msk [vmem:[#allocation10 + $0x4] sm:$0xf] %vm154_vm2, %v160_v32 }
 0x1a4   :  { %560 = shalt.err (!%p557_p8)
}
 0x1a5   :  { %s561_s29 = scalar_lea.hbm %s823_s8, 256 }
 0x1a6   :  { %p562_p9 = scmp.ne.s32.totalorder %s823_s8, %s561_s29  ;;  %p565_p10 = scmp.lt.u32.totalorder %s561_s29, %s823_s8 }
 0x1a8   :  { %p567_p11 = pnand %p565_p10, %p562_p9 }
 0x1aa   :  { %570 = shalt.err (!%p567_p11)
}
 0x1ab   :  { %363 = dma.vmem_to_hbm [thread:$0]  %s358_s6, 256, %s823_s8, [#allocation12], %s626_s19, %s626_s19, %s627_s20   ;;  %v165_v33 = vpop.permute.xlu0 %164  ;;  %v170_v34 = vpop.permute.xlu1 %169 }
 0x1ac   :  { %168 = vst.msk [vmem:[#allocation10 + $0x8] sm:$0xf] %vm154_vm2, %v165_v33  ;;  %173 = vst.msk [vmem:[#allocation10 + $0xc] sm:$0xf] %vm154_vm2, %v170_v34  ;;  %s571_s14 = scalar_lea.vmem %s346_s0, 256  ;;  %p576_p13 = scmp.lt.s32.totalorder %s346_s0, %s346_s0 }
 0x1ad   :  { %p572_p12 = scmp.ne.s32.totalorder %s346_s0, %s571_s14  ;;  %p577_p0 = scmp.lt.s32.totalorder %s571_s14, %s571_s14 }
 0x1af   :  { %p578_p1 = por %p577_p0, %p576_p13 }
 0x1b1   :  { %p579_p2 = pnand %p578_p1, %p572_p12 }
 0x1b3   :  { %582 = shalt.err (!%p579_p2)
}
 0x1b4   :  { %s583_s3 = scalar_lea.hbm %s822_s7, 256 }
 0x1b5   :  { %p584_p3 = scmp.ne.s32.totalorder %s822_s7, %s583_s3  ;;  %p587_p4 = scmp.lt.u32.totalorder %s583_s3, %s822_s7 }
 0x1b7   :  { %p589_p5 = pnand %p587_p4, %p584_p3 }
 0x1b9   :  { %592 = shalt.err (!%p589_p5)
}
 0x1ba   :  { %351 = dma.vmem_to_hbm [thread:$0]  %s346_s0, 256, %s822_s7, [#allocation4], %s626_s19, %s626_s19, %s627_s20   ;;  %v331_v35 = vpop.permute.xlu1 %330  ;;  %v326_v36 = vpop.permute.xlu0 %325 }
 0x1bb   :  { %s638_s4 = smov [#allocation13]   ;;  %334 = vst.msk [vmem:[#allocation13 + $0x8] sm:$0xf] %vm154_vm2, %v331_v35  ;;  %329 = vst.msk [vmem:[#allocation13 + $0x4] sm:$0xf] %vm154_vm2, %v326_v36 }
 0x1bc   :  { %s369_s21 = sshll.u32 %s638_s4, 4  ;;  %s370_s21 = int_to_ptr.vmem [resolvable:$true] %s369_s21 }
 0x1bd   :  { %s593_s22 = scalar_lea.vmem %s370_s21, 256  ;;  %p598_p7 = scmp.lt.s32.totalorder %s370_s21, %s370_s21 }
 0x1be   :  { %v336_v37 = vpop.permute.xlu0 %335  ;;  %p594_p6 = scmp.ne.s32.totalorder %s370_s21, %s593_s22  ;;  %p599_p8 = scmp.lt.s32.totalorder %s593_s22, %s593_s22 }
 0x1bf   :  { %339 = vst.msk [vmem:[#allocation13 + $0xc] sm:$0xf] %vm154_vm2, %v336_v37 }
 0x1c0   :  { %p600_p9 = por %p599_p8, %p598_p7 }
 0x1c2   :  { %p601_p10 = pnand %p600_p9, %p594_p6 }
 0x1c4   :  { %604 = shalt.err (!%p601_p10)
}
 0x1c5   :  { %s605_s6 = scalar_lea.hbm %s824_s9, 256 }
 0x1c6   :  { %p606_p11 = scmp.ne.s32.totalorder %s824_s9, %s605_s6  ;;  %p609_p12 = scmp.lt.u32.totalorder %s605_s6, %s824_s9 }
 0x1c8   :  { %p611_p13 = pnand %p609_p12, %p606_p11 }
 0x1ca   :  { %614 = shalt.err (!%p611_p13)
}
 0x1cb   :  { %375 = dma.vmem_to_hbm [thread:$0]  %s370_s21, 256, %s824_s9, [#allocation12], %s626_s19, %s626_s19, %s627_s20  }
 0x1cc   :  { %621 = dma.done.wait [#allocation4], 256  }
 0x1cd   :  { %622 = vsyncadd [#allocation4], 4294967040 }
 0x1ce   :  { %623 = dma.done.wait [#allocation12], 512  }
 0x1cf   :  { %624 = vsyncadd [#allocation12], 4294966784 }
 0x1d0   :  { %385 = vsyncpa [#allocation3], 1 }
 0x1d1   :  { %386 = vsyncpa [#allocation6], 1 }
 0x1d2   :  { %387 = vsyncpa [#allocation9], 1 }
 0x1d3   :  { %388 = vsyncpa [#allocation4], 1 }
 0x1d4   :  { %389 = vsyncpa [#allocation12], 1 }

</bundles_post_ra>
